<compile_context>
chip_gen: v7x
topology: tpu7x:2x2x1
jax: 0.10.0
libtpu: 0.0.40
codegen_flags: <defaults>
</compile_context>

<pallas_src>
import functools

import jax
import jax.numpy as jnp
from jax.experimental import pallas as pl
from jax.experimental.pallas import tpu as pltpu


# ----------------------------- Pallas kernel ------------------------------- #
def _dit_block_kernel(z_ref, cond_ref,
                      wada_ref, bada_ref,
                      wqkv_ref, bqkv_ref,
                      wproj_ref, bproj_ref,
                      wfc1_ref, bfc1_ref,
                      wfc2_ref, bfc2_ref,
                      o_ref, attn_ref, *, seq_len, num_heads, eps):
    f32 = jnp.float32
    bf16 = jnp.bfloat16

    z = z_ref[...].astype(f32)                         # (R, H), R = Bt * N token rows
    R, H = z.shape
    N = seq_len
    Bt = R // N
    hd = H // num_heads
    attn_scale = 1.0 / float(hd) ** 0.5

    # --- adaLN-Zero: Linear(SiLU(cond)) for the Bt batch rows of this block --- #
    start = pl.multiple_of(pl.program_id(0) * Bt, Bt)
    c = cond_ref[pl.ds(start, Bt), :].astype(f32)      # (Bt, H)
    c = c * jax.nn.sigmoid(c)                          # SiLU (f32)
    ada = jnp.dot(c.astype(bf16), wada_ref[...],
                  preferred_element_type=f32) + bada_ref[...]      # (Bt, 6H) f32

    if Bt == 1:
        # Single batch row per block -> plain sublane broadcast.
        def bcast(chunk):                              # (1, 3H) -> (R, 3H) f32
            return jnp.broadcast_to(chunk, (R, chunk.shape[-1]))
    else:
        # Broadcast per-batch rows to per-token rows via an exact 0/1 one-hot
        # bf16 matmul (row r belongs to local batch r // N).
        r_iota = jax.lax.broadcasted_iota(jnp.int32, (R, Bt), 0)
        b_iota = jax.lax.broadcasted_iota(jnp.int32, (R, Bt), 1)
        lo = b_iota * N
        onehot = jnp.logical_and(r_iota >= lo, r_iota < lo + N).astype(bf16)

        def bcast(chunk):                              # (Bt, 3H) -> (R, 3H) f32
            return jnp.dot(onehot, chunk.astype(bf16), preferred_element_type=f32)

    def layer_norm(x):  # LayerNorm, elementwise_affine=False (f32, VPU/EUP)
        mu = jnp.mean(x, axis=-1, keepdims=True)
        var = jnp.mean((x - mu) ** 2, axis=-1, keepdims=True)
        return (x - mu) * jax.lax.rsqrt(var + eps)

    def linear(x_f32, w_ref, b_ref):  # bf16 MXU operands, f32 accumulate + f32 bias
        y = jnp.dot(x_f32.astype(bf16), w_ref[...], preferred_element_type=f32)
        return y + b_ref[...]

    # ------------------------------ attention ------------------------------ #
    ada_msa = bcast(ada[:, 0:3 * H])                               # (R, 3H) f32
    shift_msa = ada_msa[:, 0:H]
    scale_msa = 1.0 + ada_msa[:, H:2 * H]
    gate_msa = ada_msa[:, 2 * H:3 * H]

    x = layer_norm(z) * scale_msa + shift_msa                      # modulate, (R, H)
    qkv = linear(x, wqkv_ref, bqkv_ref)                            # (R, 3H) f32
    # Split at H-aligned boundaries (128-aligned at production H) into slabs.
    q = qkv[:, 0 * H:1 * H].reshape(Bt, N, H).astype(bf16)
    k = qkv[:, 1 * H:2 * H].reshape(Bt, N, H).astype(bf16)
    v = qkv[:, 2 * H:3 * H].reshape(Bt, N, H).astype(bf16)

    for h in range(num_heads):                                     # static unroll
        sl = slice(h * hd, (h + 1) * hd)
        qh, kh, vh = q[:, :, sl], k[:, :, sl], v[:, :, sl]         # (Bt, N, hd) bf16
        s = jnp.einsum("bqd,bkd->bqk", qh, kh,
                       preferred_element_type=f32) * attn_scale    # (Bt, N, N) f32
        s = s - jnp.max(s, axis=-1, keepdims=True)
        p = jnp.exp(s)
        p = p * pl.reciprocal(jnp.sum(p, axis=-1, keepdims=True), approx=False)
        oh = jnp.einsum("bqk,bkd->bqd", p.astype(bf16), vh,
                        preferred_element_type=f32)                # (Bt, N, hd) f32
        # Write the head output straight into the (R, H) VMEM scratch slice
        # instead of building a list + lane-axis concatenate.
        attn_ref[:, sl] = oh.reshape(R, hd)

    attn = linear(attn_ref[...], wproj_ref, bproj_ref)             # (R, H) f32
    z = z + gate_msa * attn              # residual_dropout is identity (p=0 / eval)

    # --------------------------------- MLP --------------------------------- #
    ada_mlp = bcast(ada[:, 3 * H:6 * H])                           # (R, 3H) f32
    shift_mlp = ada_mlp[:, 0:H]
    scale_mlp = 1.0 + ada_mlp[:, H:2 * H]
    gate_mlp = ada_mlp[:, 2 * H:3 * H]

    y = layer_norm(z) * scale_mlp + shift_mlp
    hmid = jax.nn.gelu(linear(y, wfc1_ref, bfc1_ref),
                       approximate=True).astype(bf16)              # (R, M) bf16
    y = jnp.dot(hmid, wfc2_ref[...],
                preferred_element_type=f32) + bfc2_ref[...]        # (R, H) f32

    z = z + gate_mlp * y
    o_ref[...] = z.astype(o_ref.dtype)


# ------------------------------- wrapper ----------------------------------- #
def _choose_block_batch(batch, seq, target_rows=256):
    """Largest divisor Bt of `batch` with Bt*seq <= target_rows, preferring
    choices that keep G = batch/Bt >= 2 (so both v7x TensorCores get work)."""
    want = max(1, target_rows // seq)
    divisors = [d for d in range(1, batch + 1) if batch % d == 0]
    fitting = [d for d in divisors if d <= want]
    multi = [d for d in fitting if batch // d >= 2]
    pool = multi or fitting or [1]
    return max(pool)


def protein_latent_dit_block(z_emb, cond, params, *, num_heads, eps=1e-6,
                             target_rows=256):
    """z_emb: (B, N, H), cond: (B, 1, H) -> (B, N, H).

    NOTE: for production use H, 3H, 6H and mlp hidden M should be multiples of
    128 (lane-dense tiles); the toy shapes below only exercise correctness.
    """
    B, N, H = z_emb.shape
    M = params["wfc1"].shape[1]

    Bt = _choose_block_batch(B, N, target_rows)
    G = B // Bt
    R = Bt * N

    z2d = z_emb.reshape(B * N, H)             # token-row major (batch-major rows)
    cond2d = cond[:, 0, :]                    # (B, H)

    bf16, f32 = jnp.bfloat16, jnp.float32
    wada, bada = params["wada"].astype(bf16), params["bada"].astype(f32)
    wqkv, bqkv = params["wqkv"].astype(bf16), params["bqkv"].astype(f32)
    wproj, bproj = params["wproj"].astype(bf16), params["bproj"].astype(f32)
    wfc1, bfc1 = params["wfc1"].astype(bf16), params["bfc1"].astype(f32)
    wfc2, bfc2 = params["wfc2"].astype(bf16), params["bfc2"].astype(f32)

    # ---- explicit VMEM budget: double-buffered weights/biases/cond/io tiles
    # plus single-buffered f32/bf16 activation intermediates, with headroom.
    dbuf = 2
    weight_bytes = dbuf * 2 * (H * 6 * H + H * 3 * H + H * H + H * M + M * H)
    bias_bytes = dbuf * 4 * (6 * H + 3 * H + H + M + H)
    cond_bytes = dbuf * 4 * B * H
    io_bytes = dbuf * 2 * R * H * jnp.dtype(z_emb.dtype).itemsize
    act_bytes = (4 * R * (3 * H + 3 * H + 3 * H + M + 2 * H)   # f32 intermediates
                 + 2 * R * (3 * H + M)                         # bf16 copies
                 + 3 * 4 * Bt * N * N)                         # per-head scores
    budget = int(1.5 * (weight_bytes + bias_bytes + cond_bytes + io_bytes + act_bytes))
    vmem_limit = min(max(budget, 32 * 1024 * 1024), 100 * 1024 * 1024)

    kernel = functools.partial(_dit_block_kernel, seq_len=N,
                               num_heads=num_heads, eps=eps)
    const = lambda g: (0, 0)                  # untiled (weights / biases / cond)

    out2d = pl.pallas_call(
        kernel,
        out_shape=jax.ShapeDtypeStruct((B * N, H), z_emb.dtype),
        grid=(G,),
        in_specs=[
            pl.BlockSpec((R, H), lambda g: (g, 0)),     # z rows (Bt*N per step)
            pl.BlockSpec((B, H), const),                # cond (tiny, resident)
            pl.BlockSpec((H, 6 * H), const),            # adaLN weight (bf16)
            pl.BlockSpec((1, 6 * H), const),            # adaLN bias
            pl.BlockSpec((H, 3 * H), const),            # qkv weight (bf16)
            pl.BlockSpec((1, 3 * H), const),            # qkv bias
            pl.BlockSpec((H, H), const),                # proj weight (bf16)
            pl.BlockSpec((1, H), const),                # proj bias
            pl.BlockSpec((H, M), const),                # fc1 weight (bf16)
            pl.BlockSpec((1, M), const),                # fc1 bias
            pl.BlockSpec((M, H), const),                # fc2 weight (bf16)
            pl.BlockSpec((1, H), const),                # fc2 bias
        ],
        out_specs=pl.BlockSpec((R, H), lambda g: (g, 0)),
        scratch_shapes=[pltpu.VMEM((R, H), jnp.float32)],   # per-head attn outputs
        compiler_params=pltpu.CompilerParams(
            dimension_semantics=("parallel",),
            vmem_limit_bytes=vmem_limit),
    )(z2d, cond2d, wada, bada, wqkv, bqkv, wproj, bproj, wfc1, bfc1, wfc2, bfc2)

    return out2d.reshape(B, N, H)


# ------------------------- pure-JAX reference ------------------------------ #
def reference(z, cond, p, *, num_heads, eps=1e-6):
    B, N, H = z.shape
    hd = H // num_heads

    def ln(x):
        mu = jnp.mean(x, axis=-1, keepdims=True)
        var = jnp.mean((x - mu) ** 2, axis=-1, keepdims=True)
        return (x - mu) / jnp.sqrt(var + eps)

    def modulate(x, shift, scale):
        return x * (1 + scale[:, None, :]) + shift[:, None, :]

    ada = jax.nn.silu(cond) @ p["wada"] + p["bada"]            # (B, 1, 6H)
    chunks = jnp.split(ada, 6, axis=-1)
    shift_msa, scale_msa, gate_msa, shift_mlp, scale_mlp, gate_mlp = [c[:, 0, :] for c in chunks]

    x = modulate(ln(z), shift_msa, scale_msa)
    qkv = x @ p["wqkv"] + p["bqkv"]                            # (B, N, 3H)
    qkv = qkv.reshape(B, N, 3, num_heads, hd)
    q, k, v = qkv[:, :, 0], qkv[:, :, 1], qkv[:, :, 2]         # (B, N, nh, hd)
    s = jnp.einsum("bqhd,bkhd->bhqk", q, k) / jnp.sqrt(hd).astype(jnp.float32)
    pattn = jax.nn.softmax(s, axis=-1)
    a = jnp.einsum("bhqk,bkhd->bqhd", pattn, v).reshape(B, N, H)
    a = a @ p["wproj"] + p["bproj"]
    z = z + gate_msa[:, None, :] * a

    y = modulate(ln(z), shift_mlp, scale_mlp)
    hmid = jax.nn.gelu(y @ p["wfc1"] + p["bfc1"], approximate=True)
    y = hmid @ p["wfc2"] + p["bfc2"]
    z = z + gate_mlp[:, None, :] * y
    return z


# --------------------------------- main ------------------------------------ #
if __name__ == "__main__":
    # Small shapes consistent with the module: hidden=32, heads=4 (head_dim=8),
    # mlp_ratio=4 -> mlp_hidden=128, seq=8.  Two batch sizes exercise both the
    # Bt=1 (broadcast) and Bt>1 (one-hot matmul) modulation paths.
    def run_case(key, B, N, H, NH, mlp_ratio=4.0):
        M = int(H * mlp_ratio)
        ks = jax.random.split(key, 12)

        def w(k, shape, scale=0.05):
            return scale * jax.random.normal(k, shape, dtype=jnp.float32)

        params = {
            "wada": w(ks[0], (H, 6 * H)), "bada": w(ks[1], (1, 6 * H)),
            "wqkv": w(ks[2], (H, 3 * H)), "bqkv": w(ks[3], (1, 3 * H)),
            "wproj": w(ks[4], (H, H)),    "bproj": w(ks[5], (1, H)),
            "wfc1": w(ks[6], (H, M)),     "bfc1": w(ks[7], (1, M)),
            "wfc2": w(ks[8], (M, H)),     "bfc2": w(ks[9], (1, H)),
        }
        z_emb = jax.random.normal(ks[10], (B, N, H), dtype=jnp.float32)
        cond = jax.random.normal(ks[11], (B, 1, H), dtype=jnp.float32)

        out = jax.block_until_ready(
            protein_latent_dit_block(z_emb, cond, params, num_heads=NH))
        ref = jax.block_until_ready(reference(z_emb, cond, params, num_heads=NH))
        assert out.shape == (B, N, H)
        err = float(jnp.max(jnp.abs(out - ref)))
        # bf16 MXU operands with f32 accumulation -> slightly looser tolerance.
        assert jnp.allclose(out, ref, atol=2e-2, rtol=2e-2), err

    key = jax.random.PRNGKey(0)
    k1, k2 = jax.random.split(key)
    run_case(k1, B=2, N=8, H=32, NH=4)   # Bt=1, G=2
    run_case(k2, B=4, N=8, H=32, NH=4)   # Bt=2, G=2

    print("KERNEL_OK")
</pallas_src>

<mosaic_0001>
module attributes {stable_mosaic.version = 11 : i64} {
  func.func @_dit_block_kernel(%arg0: i32, %arg1: memref<8x32xf32, #tpu.memory_space<vmem>>, %arg2: memref<2x32xf32, #tpu.memory_space<vmem>>, %arg3: memref<32x192xbf16, #tpu.memory_space<vmem>>, %arg4: memref<1x192xf32, #tpu.memory_space<vmem>>, %arg5: memref<32x96xbf16, #tpu.memory_space<vmem>>, %arg6: memref<1x96xf32, #tpu.memory_space<vmem>>, %arg7: memref<32x32xbf16, #tpu.memory_space<vmem>>, %arg8: memref<1x32xf32, #tpu.memory_space<vmem>>, %arg9: memref<32x128xbf16, #tpu.memory_space<vmem>>, %arg10: memref<1x128xf32, #tpu.memory_space<vmem>>, %arg11: memref<128x32xbf16, #tpu.memory_space<vmem>>, %arg12: memref<1x32xf32, #tpu.memory_space<vmem>>, %arg13: memref<8x32xf32, #tpu.memory_space<vmem>>, %arg14: memref<8x32xf32, #tpu.memory_space<vmem>>) attributes {dimension_semantics = [#tpu.dimension_semantics<parallel>], iteration_bounds = array<i64: 2>, scalar_prefetch = 0 : i64, scratch_operands = 1 : i64, tpu.core_type = #tpu.core_type<tc>, window_params = [{transform_indices = @transform_0, window_bounds = array<i64: 8, 32>}, {pipeline_mode = #tpu.pipeline_mode<synchronous>, transform_indices = @transform_1, window_bounds = array<i64: 2, 32>}, {pipeline_mode = #tpu.pipeline_mode<synchronous>, transform_indices = @transform_2, window_bounds = array<i64: 32, 192>}, {pipeline_mode = #tpu.pipeline_mode<synchronous>, transform_indices = @transform_3, window_bounds = array<i64: 1, 192>}, {pipeline_mode = #tpu.pipeline_mode<synchronous>, transform_indices = @transform_4, window_bounds = array<i64: 32, 96>}, {pipeline_mode = #tpu.pipeline_mode<synchronous>, transform_indices = @transform_5, window_bounds = array<i64: 1, 96>}, {pipeline_mode = #tpu.pipeline_mode<synchronous>, transform_indices = @transform_6, window_bounds = array<i64: 32, 32>}, {pipeline_mode = #tpu.pipeline_mode<synchronous>, transform_indices = @transform_7, window_bounds = array<i64: 1, 32>}, {pipeline_mode = #tpu.pipeline_mode<synchronous>, transform_indices = @transform_8, window_bounds = array<i64: 32, 128>}, {pipeline_mode = #tpu.pipeline_mode<synchronous>, transform_indices = @transform_9, window_bounds = array<i64: 1, 128>}, {pipeline_mode = #tpu.pipeline_mode<synchronous>, transform_indices = @transform_10, window_bounds = array<i64: 128, 32>}, {pipeline_mode = #tpu.pipeline_mode<synchronous>, transform_indices = @transform_11, window_bounds = array<i64: 1, 32>}, {transform_indices = @transform_12, window_bounds = array<i64: 8, 32>}]} {
    %c0 = arith.constant 0 : index
    %c0_0 = arith.constant 0 : index
    %0 = vector.load %arg1[%c0, %c0_0] : memref<8x32xf32, #tpu.memory_space<vmem>>, vector<8x32xf32>
    %c1_i32 = arith.constant 1 : i32
    %1 = arith.muli %arg0, %c1_i32 : i32
    %2 = tpu.assume_multiple %1, 1 : i32
    %3 = arith.index_cast %2 : i32 to index
    %c0_1 = arith.constant 0 : index
    %4 = vector.load %arg2[%3, %c0_1] : memref<2x32xf32, #tpu.memory_space<vmem>>, vector<1x32xf32>
    %5 = arith.negf %4 : vector<1x32xf32>
    %6 = math.exp %5 : vector<1x32xf32>
    %cst = arith.constant 1.000000e+00 : f32
    %7 = vector.broadcast %cst : f32 to vector<1x32xf32>
    %8 = arith.addf %7, %6 : vector<1x32xf32>
    %9 = arith.divf %7, %8 : vector<1x32xf32>
    %10 = arith.mulf %4, %9 : vector<1x32xf32>
    %11 = arith.truncf %10 : vector<1x32xf32> to vector<1x32xbf16>
    %c0_2 = arith.constant 0 : index
    %c0_3 = arith.constant 0 : index
    %12 = vector.load %arg3[%c0_2, %c0_3] : memref<32x192xbf16, #tpu.memory_space<vmem>>, vector<32x192xbf16>
    %cst_4 = arith.constant dense<0.000000e+00> : vector<1x192xf32>
    %13 = tpu.matmul %11, %12, %cst_4 {dimension_numbers = #tpu.dot_dimension_numbers<[1], [0], [0], [1], [0, 0, 1, 1], [], []>} : vector<1x32xbf16>, vector<32x192xbf16>, vector<1x192xf32> -> vector<1x192xf32>
    %c0_5 = arith.constant 0 : index
    %c0_6 = arith.constant 0 : index
    %14 = vector.load %arg4[%c0_5, %c0_6] : memref<1x192xf32, #tpu.memory_space<vmem>>, vector<1x192xf32>
    %15 = arith.addf %13, %14 : vector<1x192xf32>
    %16 = vector.extract_strided_slice %15 {offsets = [0, 0], sizes = [1, 96], strides = [1, 1]} : vector<1x192xf32> to vector<1x96xf32>
    %17 = vector.shape_cast %16 : vector<1x96xf32> to vector<1x96xf32>
    %18 = vector.broadcast %17 : vector<1x96xf32> to vector<8x96xf32>
    %19 = vector.extract_strided_slice %18 {offsets = [0, 0], sizes = [8, 32], strides = [1, 1]} : vector<8x96xf32> to vector<8x32xf32>
    %20 = vector.extract_strided_slice %18 {offsets = [0, 32], sizes = [8, 32], strides = [1, 1]} : vector<8x96xf32> to vector<8x32xf32>
    %cst_7 = arith.constant 1.000000e+00 : f32
    %21 = vector.broadcast %cst_7 : f32 to vector<8x32xf32>
    %22 = arith.addf %21, %20 : vector<8x32xf32>
    %23 = vector.extract_strided_slice %18 {offsets = [0, 64], sizes = [8, 32], strides = [1, 1]} : vector<8x96xf32> to vector<8x32xf32>
    %cst_8 = arith.constant dense<0.000000e+00> : vector<8xf32>
    %24 = vector.multi_reduction <add>, %0, %cst_8 [1] : vector<8x32xf32> to vector<8xf32>
    %25 = vector.shape_cast %24 : vector<8xf32> to vector<8x1xf32>
    %cst_9 = arith.constant 3.200000e+01 : f32
    %26 = vector.broadcast %cst_9 : f32 to vector<8x1xf32>
    %27 = arith.divf %25, %26 : vector<8x1xf32>
    %28 = vector.broadcast %27 : vector<8x1xf32> to vector<8x32xf32>
    %29 = arith.subf %0, %28 : vector<8x32xf32>
    %30 = arith.mulf %29, %29 : vector<8x32xf32>
    %cst_10 = arith.constant dense<0.000000e+00> : vector<8xf32>
    %31 = vector.multi_reduction <add>, %30, %cst_10 [1] : vector<8x32xf32> to vector<8xf32>
    %32 = vector.shape_cast %31 : vector<8xf32> to vector<8x1xf32>
    %cst_11 = arith.constant 3.200000e+01 : f32
    %33 = vector.broadcast %cst_11 : f32 to vector<8x1xf32>
    %34 = arith.divf %32, %33 : vector<8x1xf32>
    %35 = vector.broadcast %27 : vector<8x1xf32> to vector<8x32xf32>
    %36 = arith.subf %0, %35 : vector<8x32xf32>
    %cst_12 = arith.constant 9.99999997E-7 : f32
    %37 = vector.broadcast %cst_12 : f32 to vector<8x1xf32>
    %38 = arith.addf %34, %37 : vector<8x1xf32>
    %39 = math.rsqrt %38 : vector<8x1xf32>
    %40 = vector.broadcast %39 : vector<8x1xf32> to vector<8x32xf32>
    %41 = arith.mulf %36, %40 : vector<8x32xf32>
    %42 = arith.mulf %41, %22 : vector<8x32xf32>
    %43 = arith.addf %42, %19 : vector<8x32xf32>
    %44 = arith.truncf %43 : vector<8x32xf32> to vector<8x32xbf16>
    %c0_13 = arith.constant 0 : index
    %c0_14 = arith.constant 0 : index
    %45 = vector.load %arg5[%c0_13, %c0_14] : memref<32x96xbf16, #tpu.memory_space<vmem>>, vector<32x96xbf16>
    %cst_15 = arith.constant dense<0.000000e+00> : vector<8x96xf32>
    %46 = tpu.matmul %44, %45, %cst_15 {dimension_numbers = #tpu.dot_dimension_numbers<[1], [0], [0], [1], [0, 0, 1, 1], [], []>} : vector<8x32xbf16>, vector<32x96xbf16>, vector<8x96xf32> -> vector<8x96xf32>
    %c0_16 = arith.constant 0 : index
    %c0_17 = arith.constant 0 : index
    %47 = vector.load %arg6[%c0_16, %c0_17] : memref<1x96xf32, #tpu.memory_space<vmem>>, vector<1x96xf32>
    %48 = vector.broadcast %47 : vector<1x96xf32> to vector<8x96xf32>
    %49 = arith.addf %46, %48 : vector<8x96xf32>
    %50 = vector.extract_strided_slice %49 {offsets = [0, 0], sizes = [8, 32], strides = [1, 1]} : vector<8x96xf32> to vector<8x32xf32>
    %51 = vector.shape_cast %50 : vector<8x32xf32> to vector<1x8x32xf32>
    %52 = arith.truncf %51 : vector<1x8x32xf32> to vector<1x8x32xbf16>
    %53 = vector.extract_strided_slice %49 {offsets = [0, 32], sizes = [8, 32], strides = [1, 1]} : vector<8x96xf32> to vector<8x32xf32>
    %54 = vector.shape_cast %53 : vector<8x32xf32> to vector<1x8x32xf32>
    %55 = arith.truncf %54 : vector<1x8x32xf32> to vector<1x8x32xbf16>
    %56 = vector.extract_strided_slice %49 {offsets = [0, 64], sizes = [8, 32], strides = [1, 1]} : vector<8x96xf32> to vector<8x32xf32>
    %57 = vector.shape_cast %56 : vector<8x32xf32> to vector<1x8x32xf32>
    %58 = arith.truncf %57 : vector<1x8x32xf32> to vector<1x8x32xbf16>
    %59 = vector.extract_strided_slice %52 {offsets = [0, 0, 0], sizes = [1, 8, 8], strides = [1, 1, 1]} : vector<1x8x32xbf16> to vector<1x8x8xbf16>
    %60 = vector.extract_strided_slice %55 {offsets = [0, 0, 0], sizes = [1, 8, 8], strides = [1, 1, 1]} : vector<1x8x32xbf16> to vector<1x8x8xbf16>
    %61 = vector.extract_strided_slice %58 {offsets = [0, 0, 0], sizes = [1, 8, 8], strides = [1, 1, 1]} : vector<1x8x32xbf16> to vector<1x8x8xbf16>
    "tpu.trace_start"() <{level = 10 : i32, message = "bqd,bkd->bqk"}> : () -> ()
    %cst_18 = arith.constant dense<0.000000e+00> : vector<1x8x8xf32>
    %62 = tpu.matmul %59, %60, %cst_18 {dimension_numbers = #tpu.dot_dimension_numbers<[2], [2], [1], [1], [0, 0, 0, 1, 1, 1], [0], [0]>} : vector<1x8x8xbf16>, vector<1x8x8xbf16>, vector<1x8x8xf32> -> vector<1x8x8xf32>
    "tpu.trace_stop"() : () -> ()
    %cst_19 = arith.constant 0.353553385 : f32
    %63 = vector.broadcast %cst_19 : f32 to vector<1x8x8xf32>
    %64 = arith.mulf %62, %63 : vector<1x8x8xf32>
    %cst_20 = arith.constant dense<0xFF800000> : vector<1x8xf32>
    %65 = vector.multi_reduction <maximumf>, %64, %cst_20 [2] : vector<1x8x8xf32> to vector<1x8xf32>
    %66 = vector.shape_cast %65 : vector<1x8xf32> to vector<1x8x1xf32>
    %67 = vector.broadcast %66 : vector<1x8x1xf32> to vector<1x8x8xf32>
    %68 = arith.subf %64, %67 : vector<1x8x8xf32>
    %69 = math.exp %68 : vector<1x8x8xf32>
    %cst_21 = arith.constant dense<0.000000e+00> : vector<1x8xf32>
    %70 = vector.multi_reduction <add>, %69, %cst_21 [2] : vector<1x8x8xf32> to vector<1x8xf32>
    %71 = vector.shape_cast %70 : vector<1x8xf32> to vector<1x8x1xf32>
    %72 = tpu.reciprocal %71 : vector<1x8x1xf32> -> vector<1x8x1xf32>
    %73 = vector.broadcast %72 : vector<1x8x1xf32> to vector<1x8x8xf32>
    %74 = arith.mulf %69, %73 : vector<1x8x8xf32>
    %75 = arith.truncf %74 : vector<1x8x8xf32> to vector<1x8x8xbf16>
    "tpu.trace_start"() <{level = 10 : i32, message = "bqk,bkd->bqd"}> : () -> ()
    %cst_22 = arith.constant dense<0.000000e+00> : vector<1x8x8xf32>
    %76 = tpu.matmul %75, %61, %cst_22 {dimension_numbers = #tpu.dot_dimension_numbers<[2], [1], [1], [2], [0, 0, 0, 1, 1, 2], [0], [0]>} : vector<1x8x8xbf16>, vector<1x8x8xbf16>, vector<1x8x8xf32> -> vector<1x8x8xf32>
    "tpu.trace_stop"() : () -> ()
    %77 = vector.shape_cast %76 : vector<1x8x8xf32> to vector<8x8xf32>
    %c0_23 = arith.constant 0 : index
    %c0_24 = arith.constant 0 : index
    %78 = vector.load %arg14[%c0_23, %c0_24] : memref<8x32xf32, #tpu.memory_space<vmem>>, vector<8x8xf32>
    tpu.vector_store %arg14[%c0_23, %c0_24], %77 {strides = array<i32>} : memref<8x32xf32, #tpu.memory_space<vmem>>, vector<8x8xf32>,
    %79 = vector.extract_strided_slice %52 {offsets = [0, 0, 8], sizes = [1, 8, 8], strides = [1, 1, 1]} : vector<1x8x32xbf16> to vector<1x8x8xbf16>
    %80 = vector.extract_strided_slice %55 {offsets = [0, 0, 8], sizes = [1, 8, 8], strides = [1, 1, 1]} : vector<1x8x32xbf16> to vector<1x8x8xbf16>
    %81 = vector.extract_strided_slice %58 {offsets = [0, 0, 8], sizes = [1, 8, 8], strides = [1, 1, 1]} : vector<1x8x32xbf16> to vector<1x8x8xbf16>
    "tpu.trace_start"() <{level = 10 : i32, message = "bqd,bkd->bqk"}> : () -> ()
    %cst_25 = arith.constant dense<0.000000e+00> : vector<1x8x8xf32>
    %82 = tpu.matmul %79, %80, %cst_25 {dimension_numbers = #tpu.dot_dimension_numbers<[2], [2], [1], [1], [0, 0, 0, 1, 1, 1], [0], [0]>} : vector<1x8x8xbf16>, vector<1x8x8xbf16>, vector<1x8x8xf32> -> vector<1x8x8xf32>
    "tpu.trace_stop"() : () -> ()
    %cst_26 = arith.constant 0.353553385 : f32
    %83 = vector.broadcast %cst_26 : f32 to vector<1x8x8xf32>
    %84 = arith.mulf %82, %83 : vector<1x8x8xf32>
    %cst_27 = arith.constant dense<0xFF800000> : vector<1x8xf32>
    %85 = vector.multi_reduction <maximumf>, %84, %cst_27 [2] : vector<1x8x8xf32> to vector<1x8xf32>
    %86 = vector.shape_cast %85 : vector<1x8xf32> to vector<1x8x1xf32>
    %87 = vector.broadcast %86 : vector<1x8x1xf32> to vector<1x8x8xf32>
    %88 = arith.subf %84, %87 : vector<1x8x8xf32>
    %89 = math.exp %88 : vector<1x8x8xf32>
    %cst_28 = arith.constant dense<0.000000e+00> : vector<1x8xf32>
    %90 = vector.multi_reduction <add>, %89, %cst_28 [2] : vector<1x8x8xf32> to vector<1x8xf32>
    %91 = vector.shape_cast %90 : vector<1x8xf32> to vector<1x8x1xf32>
    %92 = tpu.reciprocal %91 : vector<1x8x1xf32> -> vector<1x8x1xf32>
    %93 = vector.broadcast %92 : vector<1x8x1xf32> to vector<1x8x8xf32>
    %94 = arith.mulf %89, %93 : vector<1x8x8xf32>
    %95 = arith.truncf %94 : vector<1x8x8xf32> to vector<1x8x8xbf16>
    "tpu.trace_start"() <{level = 10 : i32, message = "bqk,bkd->bqd"}> : () -> ()
    %cst_29 = arith.constant dense<0.000000e+00> : vector<1x8x8xf32>
    %96 = tpu.matmul %95, %81, %cst_29 {dimension_numbers = #tpu.dot_dimension_numbers<[2], [1], [1], [2], [0, 0, 0, 1, 1, 2], [0], [0]>} : vector<1x8x8xbf16>, vector<1x8x8xbf16>, vector<1x8x8xf32> -> vector<1x8x8xf32>
    "tpu.trace_stop"() : () -> ()
    %97 = vector.shape_cast %96 : vector<1x8x8xf32> to vector<8x8xf32>
    %c0_30 = arith.constant 0 : index
    %c8 = arith.constant 8 : index
    %98 = vector.load %arg14[%c0_30, %c8] : memref<8x32xf32, #tpu.memory_space<vmem>>, vector<8x8xf32>
    tpu.vector_store %arg14[%c0_30, %c8], %97 {strides = array<i32>} : memref<8x32xf32, #tpu.memory_space<vmem>>, vector<8x8xf32>,
    %99 = vector.extract_strided_slice %52 {offsets = [0, 0, 16], sizes = [1, 8, 8], strides = [1, 1, 1]} : vector<1x8x32xbf16> to vector<1x8x8xbf16>
    %100 = vector.extract_strided_slice %55 {offsets = [0, 0, 16], sizes = [1, 8, 8], strides = [1, 1, 1]} : vector<1x8x32xbf16> to vector<1x8x8xbf16>
    %101 = vector.extract_strided_slice %58 {offsets = [0, 0, 16], sizes = [1, 8, 8], strides = [1, 1, 1]} : vector<1x8x32xbf16> to vector<1x8x8xbf16>
    "tpu.trace_start"() <{level = 10 : i32, message = "bqd,bkd->bqk"}> : () -> ()
    %cst_31 = arith.constant dense<0.000000e+00> : vector<1x8x8xf32>
    %102 = tpu.matmul %99, %100, %cst_31 {dimension_numbers = #tpu.dot_dimension_numbers<[2], [2], [1], [1], [0, 0, 0, 1, 1, 1], [0], [0]>} : vector<1x8x8xbf16>, vector<1x8x8xbf16>, vector<1x8x8xf32> -> vector<1x8x8xf32>
    "tpu.trace_stop"() : () -> ()
    %cst_32 = arith.constant 0.353553385 : f32
    %103 = vector.broadcast %cst_32 : f32 to vector<1x8x8xf32>
    %104 = arith.mulf %102, %103 : vector<1x8x8xf32>
    %cst_33 = arith.constant dense<0xFF800000> : vector<1x8xf32>
    %105 = vector.multi_reduction <maximumf>, %104, %cst_33 [2] : vector<1x8x8xf32> to vector<1x8xf32>
    %106 = vector.shape_cast %105 : vector<1x8xf32> to vector<1x8x1xf32>
    %107 = vector.broadcast %106 : vector<1x8x1xf32> to vector<1x8x8xf32>
    %108 = arith.subf %104, %107 : vector<1x8x8xf32>
    %109 = math.exp %108 : vector<1x8x8xf32>
    %cst_34 = arith.constant dense<0.000000e+00> : vector<1x8xf32>
    %110 = vector.multi_reduction <add>, %109, %cst_34 [2] : vector<1x8x8xf32> to vector<1x8xf32>
    %111 = vector.shape_cast %110 : vector<1x8xf32> to vector<1x8x1xf32>
    %112 = tpu.reciprocal %111 : vector<1x8x1xf32> -> vector<1x8x1xf32>
    %113 = vector.broadcast %112 : vector<1x8x1xf32> to vector<1x8x8xf32>
    %114 = arith.mulf %109, %113 : vector<1x8x8xf32>
    %115 = arith.truncf %114 : vector<1x8x8xf32> to vector<1x8x8xbf16>
    "tpu.trace_start"() <{level = 10 : i32, message = "bqk,bkd->bqd"}> : () -> ()
    %cst_35 = arith.constant dense<0.000000e+00> : vector<1x8x8xf32>
    %116 = tpu.matmul %115, %101, %cst_35 {dimension_numbers = #tpu.dot_dimension_numbers<[2], [1], [1], [2], [0, 0, 0, 1, 1, 2], [0], [0]>} : vector<1x8x8xbf16>, vector<1x8x8xbf16>, vector<1x8x8xf32> -> vector<1x8x8xf32>
    "tpu.trace_stop"() : () -> ()
    %117 = vector.shape_cast %116 : vector<1x8x8xf32> to vector<8x8xf32>
    %c0_36 = arith.constant 0 : index
    %c16 = arith.constant 16 : index
    %118 = vector.load %arg14[%c0_36, %c16] : memref<8x32xf32, #tpu.memory_space<vmem>>, vector<8x8xf32>
    tpu.vector_store %arg14[%c0_36, %c16], %117 {strides = array<i32>} : memref<8x32xf32, #tpu.memory_space<vmem>>, vector<8x8xf32>,
    %119 = vector.extract_strided_slice %52 {offsets = [0, 0, 24], sizes = [1, 8, 8], strides = [1, 1, 1]} : vector<1x8x32xbf16> to vector<1x8x8xbf16>
    %120 = vector.extract_strided_slice %55 {offsets = [0, 0, 24], sizes = [1, 8, 8], strides = [1, 1, 1]} : vector<1x8x32xbf16> to vector<1x8x8xbf16>
    %121 = vector.extract_strided_slice %58 {offsets = [0, 0, 24], sizes = [1, 8, 8], strides = [1, 1, 1]} : vector<1x8x32xbf16> to vector<1x8x8xbf16>
    "tpu.trace_start"() <{level = 10 : i32, message = "bqd,bkd->bqk"}> : () -> ()
    %cst_37 = arith.constant dense<0.000000e+00> : vector<1x8x8xf32>
    %122 = tpu.matmul %119, %120, %cst_37 {dimension_numbers = #tpu.dot_dimension_numbers<[2], [2], [1], [1], [0, 0, 0, 1, 1, 1], [0], [0]>} : vector<1x8x8xbf16>, vector<1x8x8xbf16>, vector<1x8x8xf32> -> vector<1x8x8xf32>
    "tpu.trace_stop"() : () -> ()
    %cst_38 = arith.constant 0.353553385 : f32
    %123 = vector.broadcast %cst_38 : f32 to vector<1x8x8xf32>
    %124 = arith.mulf %122, %123 : vector<1x8x8xf32>
    %cst_39 = arith.constant dense<0xFF800000> : vector<1x8xf32>
    %125 = vector.multi_reduction <maximumf>, %124, %cst_39 [2] : vector<1x8x8xf32> to vector<1x8xf32>
    %126 = vector.shape_cast %125 : vector<1x8xf32> to vector<1x8x1xf32>
    %127 = vector.broadcast %126 : vector<1x8x1xf32> to vector<1x8x8xf32>
    %128 = arith.subf %124, %127 : vector<1x8x8xf32>
    %129 = math.exp %128 : vector<1x8x8xf32>
    %cst_40 = arith.constant dense<0.000000e+00> : vector<1x8xf32>
    %130 = vector.multi_reduction <add>, %129, %cst_40 [2] : vector<1x8x8xf32> to vector<1x8xf32>
    %131 = vector.shape_cast %130 : vector<1x8xf32> to vector<1x8x1xf32>
    %132 = tpu.reciprocal %131 : vector<1x8x1xf32> -> vector<1x8x1xf32>
    %133 = vector.broadcast %132 : vector<1x8x1xf32> to vector<1x8x8xf32>
    %134 = arith.mulf %129, %133 : vector<1x8x8xf32>
    %135 = arith.truncf %134 : vector<1x8x8xf32> to vector<1x8x8xbf16>
    "tpu.trace_start"() <{level = 10 : i32, message = "bqk,bkd->bqd"}> : () -> ()
    %cst_41 = arith.constant dense<0.000000e+00> : vector<1x8x8xf32>
    %136 = tpu.matmul %135, %121, %cst_41 {dimension_numbers = #tpu.dot_dimension_numbers<[2], [1], [1], [2], [0, 0, 0, 1, 1, 2], [0], [0]>} : vector<1x8x8xbf16>, vector<1x8x8xbf16>, vector<1x8x8xf32> -> vector<1x8x8xf32>
    "tpu.trace_stop"() : () -> ()
    %137 = vector.shape_cast %136 : vector<1x8x8xf32> to vector<8x8xf32>
    %c0_42 = arith.constant 0 : index
    %c24 = arith.constant 24 : index
    %138 = vector.load %arg14[%c0_42, %c24] : memref<8x32xf32, #tpu.memory_space<vmem>>, vector<8x8xf32>
    tpu.vector_store %arg14[%c0_42, %c24], %137 {strides = array<i32>} : memref<8x32xf32, #tpu.memory_space<vmem>>, vector<8x8xf32>,
    %c0_43 = arith.constant 0 : index
    %c0_44 = arith.constant 0 : index
    %139 = vector.load %arg14[%c0_43, %c0_44] : memref<8x32xf32, #tpu.memory_space<vmem>>, vector<8x32xf32>
    %140 = arith.truncf %139 : vector<8x32xf32> to vector<8x32xbf16>
    %c0_45 = arith.constant 0 : index
    %c0_46 = arith.constant 0 : index
    %141 = vector.load %arg7[%c0_45, %c0_46] : memref<32x32xbf16, #tpu.memory_space<vmem>>, vector<32x32xbf16>
    %cst_47 = arith.constant dense<0.000000e+00> : vector<8x32xf32>
    %142 = tpu.matmul %140, %141, %cst_47 {dimension_numbers = #tpu.dot_dimension_numbers<[1], [0], [0], [1], [0, 0, 1, 1], [], []>} : vector<8x32xbf16>, vector<32x32xbf16>, vector<8x32xf32> -> vector<8x32xf32>
    %c0_48 = arith.constant 0 : index
    %c0_49 = arith.constant 0 : index
    %143 = vector.load %arg8[%c0_48, %c0_49] : memref<1x32xf32, #tpu.memory_space<vmem>>, vector<1x32xf32>
    %144 = vector.broadcast %143 : vector<1x32xf32> to vector<8x32xf32>
    %145 = arith.addf %142, %144 : vector<8x32xf32>
    %146 = arith.mulf %23, %145 : vector<8x32xf32>
    %147 = arith.addf %0, %146 : vector<8x32xf32>
    %148 = vector.extract_strided_slice %15 {offsets = [0, 96], sizes = [1, 96], strides = [1, 1]} : vector<1x192xf32> to vector<1x96xf32>
    %149 = vector.shape_cast %148 : vector<1x96xf32> to vector<1x96xf32>
    %150 = vector.broadcast %149 : vector<1x96xf32> to vector<8x96xf32>
    %151 = vector.extract_strided_slice %150 {offsets = [0, 0], sizes = [8, 32], strides = [1, 1]} : vector<8x96xf32> to vector<8x32xf32>
    %152 = vector.extract_strided_slice %150 {offsets = [0, 32], sizes = [8, 32], strides = [1, 1]} : vector<8x96xf32> to vector<8x32xf32>
    %cst_50 = arith.constant 1.000000e+00 : f32
    %153 = vector.broadcast %cst_50 : f32 to vector<8x32xf32>
    %154 = arith.addf %153, %152 : vector<8x32xf32>
    %155 = vector.extract_strided_slice %150 {offsets = [0, 64], sizes = [8, 32], strides = [1, 1]} : vector<8x96xf32> to vector<8x32xf32>
    %cst_51 = arith.constant dense<0.000000e+00> : vector<8xf32>
    %156 = vector.multi_reduction <add>, %147, %cst_51 [1] : vector<8x32xf32> to vector<8xf32>
    %157 = vector.shape_cast %156 : vector<8xf32> to vector<8x1xf32>
    %cst_52 = arith.constant 3.200000e+01 : f32
    %158 = vector.broadcast %cst_52 : f32 to vector<8x1xf32>
    %159 = arith.divf %157, %158 : vector<8x1xf32>
    %160 = vector.broadcast %159 : vector<8x1xf32> to vector<8x32xf32>
    %161 = arith.subf %147, %160 : vector<8x32xf32>
    %162 = arith.mulf %161, %161 : vector<8x32xf32>
    %cst_53 = arith.constant dense<0.000000e+00> : vector<8xf32>
    %163 = vector.multi_reduction <add>, %162, %cst_53 [1] : vector<8x32xf32> to vector<8xf32>
    %164 = vector.shape_cast %163 : vector<8xf32> to vector<8x1xf32>
    %cst_54 = arith.constant 3.200000e+01 : f32
    %165 = vector.broadcast %cst_54 : f32 to vector<8x1xf32>
    %166 = arith.divf %164, %165 : vector<8x1xf32>
    %167 = vector.broadcast %159 : vector<8x1xf32> to vector<8x32xf32>
    %168 = arith.subf %147, %167 : vector<8x32xf32>
    %cst_55 = arith.constant 9.99999997E-7 : f32
    %169 = vector.broadcast %cst_55 : f32 to vector<8x1xf32>
    %170 = arith.addf %166, %169 : vector<8x1xf32>
    %171 = math.rsqrt %170 : vector<8x1xf32>
    %172 = vector.broadcast %171 : vector<8x1xf32> to vector<8x32xf32>
    %173 = arith.mulf %168, %172 : vector<8x32xf32>
    %174 = arith.mulf %173, %154 : vector<8x32xf32>
    %175 = arith.addf %174, %151 : vector<8x32xf32>
    %176 = arith.truncf %175 : vector<8x32xf32> to vector<8x32xbf16>
    %c0_56 = arith.constant 0 : index
    %c0_57 = arith.constant 0 : index
    %177 = vector.load %arg9[%c0_56, %c0_57] : memref<32x128xbf16, #tpu.memory_space<vmem>>, vector<32x128xbf16>
    %cst_58 = arith.constant dense<0.000000e+00> : vector<8x128xf32>
    %178 = tpu.matmul %176, %177, %cst_58 {dimension_numbers = #tpu.dot_dimension_numbers<[1], [0], [0], [1], [0, 0, 1, 1], [], []>} : vector<8x32xbf16>, vector<32x128xbf16>, vector<8x128xf32> -> vector<8x128xf32>
    %c0_59 = arith.constant 0 : index
    %c0_60 = arith.constant 0 : index
    %179 = vector.load %arg10[%c0_59, %c0_60] : memref<1x128xf32, #tpu.memory_space<vmem>>, vector<1x128xf32>
    %180 = vector.broadcast %179 : vector<1x128xf32> to vector<8x128xf32>
    %181 = arith.addf %178, %180 : vector<8x128xf32>
    %182 = arith.mulf %181, %181 : vector<8x128xf32>
    %183 = arith.mulf %181, %182 : vector<8x128xf32>
    %cst_61 = arith.constant 4.471500e-02 : f32
    %184 = vector.broadcast %cst_61 : f32 to vector<8x128xf32>
    %185 = arith.mulf %184, %183 : vector<8x128xf32>
    %186 = arith.addf %181, %185 : vector<8x128xf32>
    %cst_62 = arith.constant 0.797884583 : f32
    %187 = vector.broadcast %cst_62 : f32 to vector<8x128xf32>
    %188 = arith.mulf %187, %186 : vector<8x128xf32>
    %189 = math.tanh %188 : vector<8x128xf32>
    %cst_63 = arith.constant 1.000000e+00 : f32
    %190 = vector.broadcast %cst_63 : f32 to vector<8x128xf32>
    %191 = arith.addf %190, %189 : vector<8x128xf32>
    %cst_64 = arith.constant 5.000000e-01 : f32
    %192 = vector.broadcast %cst_64 : f32 to vector<8x128xf32>
    %193 = arith.mulf %192, %191 : vector<8x128xf32>
    %194 = arith.mulf %181, %193 : vector<8x128xf32>
    %195 = arith.truncf %194 : vector<8x128xf32> to vector<8x128xbf16>
    %c0_65 = arith.constant 0 : index
    %c0_66 = arith.constant 0 : index
    %196 = vector.load %arg11[%c0_65, %c0_66] : memref<128x32xbf16, #tpu.memory_space<vmem>>, vector<128x32xbf16>
    %cst_67 = arith.constant dense<0.000000e+00> : vector<8x32xf32>
    %197 = tpu.matmul %195, %196, %cst_67 {dimension_numbers = #tpu.dot_dimension_numbers<[1], [0], [0], [1], [0, 0, 1, 1], [], []>} : vector<8x128xbf16>, vector<128x32xbf16>, vector<8x32xf32> -> vector<8x32xf32>
    %c0_68 = arith.constant 0 : index
    %c0_69 = arith.constant 0 : index
    %198 = vector.load %arg12[%c0_68, %c0_69] : memref<1x32xf32, #tpu.memory_space<vmem>>, vector<1x32xf32>
    %199 = vector.broadcast %198 : vector<1x32xf32> to vector<8x32xf32>
    %200 = arith.addf %197, %199 : vector<8x32xf32>
    %201 = arith.mulf %155, %200 : vector<8x32xf32>
    %202 = arith.addf %147, %201 : vector<8x32xf32>
    %c0_70 = arith.constant 0 : index
    %c0_71 = arith.constant 0 : index
    %203 = vector.load %arg13[%c0_70, %c0_71] : memref<8x32xf32, #tpu.memory_space<vmem>>, vector<8x32xf32>
    tpu.vector_store %arg13[%c0_70, %c0_71], %202 {strides = array<i32>} : memref<8x32xf32, #tpu.memory_space<vmem>>, vector<8x32xf32>,
    return
  }
  func.func @transform_0(%arg0: i32) -> (i32, i32) {
    %c0_i32 = arith.constant 0 : i32
    %c0_i32_0 = arith.constant 0 : i32
    return %arg0, %c0_i32 : i32, i32
  }
  func.func @transform_1(%arg0: i32) -> (i32, i32) {
    %c0_i32 = arith.constant 0 : i32
    %c0_i32_0 = arith.constant 0 : i32
    %c0_i32_1 = arith.constant 0 : i32
    return %c0_i32, %c0_i32_0 : i32, i32
  }
  func.func @transform_2(%arg0: i32) -> (i32, i32) {
    %c0_i32 = arith.constant 0 : i32
    %c0_i32_0 = arith.constant 0 : i32
    %c0_i32_1 = arith.constant 0 : i32
    return %c0_i32, %c0_i32_0 : i32, i32
  }
  func.func @transform_3(%arg0: i32) -> (i32, i32) {
    %c0_i32 = arith.constant 0 : i32
    %c0_i32_0 = arith.constant 0 : i32
    %c0_i32_1 = arith.constant 0 : i32
    return %c0_i32, %c0_i32_0 : i32, i32
  }
  func.func @transform_4(%arg0: i32) -> (i32, i32) {
    %c0_i32 = arith.constant 0 : i32
    %c0_i32_0 = arith.constant 0 : i32
    %c0_i32_1 = arith.constant 0 : i32
    return %c0_i32, %c0_i32_0 : i32, i32
  }
  func.func @transform_5(%arg0: i32) -> (i32, i32) {
    %c0_i32 = arith.constant 0 : i32
    %c0_i32_0 = arith.constant 0 : i32
    %c0_i32_1 = arith.constant 0 : i32
    return %c0_i32, %c0_i32_0 : i32, i32
  }
  func.func @transform_6(%arg0: i32) -> (i32, i32) {
    %c0_i32 = arith.constant 0 : i32
    %c0_i32_0 = arith.constant 0 : i32
    %c0_i32_1 = arith.constant 0 : i32
    return %c0_i32, %c0_i32_0 : i32, i32
  }
  func.func @transform_7(%arg0: i32) -> (i32, i32) {
    %c0_i32 = arith.constant 0 : i32
    %c0_i32_0 = arith.constant 0 : i32
    %c0_i32_1 = arith.constant 0 : i32
    return %c0_i32, %c0_i32_0 : i32, i32
  }
  func.func @transform_8(%arg0: i32) -> (i32, i32) {
    %c0_i32 = arith.constant 0 : i32
    %c0_i32_0 = arith.constant 0 : i32
    %c0_i32_1 = arith.constant 0 : i32
    return %c0_i32, %c0_i32_0 : i32, i32
  }
  func.func @transform_9(%arg0: i32) -> (i32, i32) {
    %c0_i32 = arith.constant 0 : i32
    %c0_i32_0 = arith.constant 0 : i32
    %c0_i32_1 = arith.constant 0 : i32
    return %c0_i32, %c0_i32_0 : i32, i32
  }
  func.func @transform_10(%arg0: i32) -> (i32, i32) {
    %c0_i32 = arith.constant 0 : i32
    %c0_i32_0 = arith.constant 0 : i32
    %c0_i32_1 = arith.constant 0 : i32
    return %c0_i32, %c0_i32_0 : i32, i32
  }
  func.func @transform_11(%arg0: i32) -> (i32, i32) {
    %c0_i32 = arith.constant 0 : i32
    %c0_i32_0 = arith.constant 0 : i32
    %c0_i32_1 = arith.constant 0 : i32
    return %c0_i32, %c0_i32_0 : i32, i32
  }
  func.func @transform_12(%arg0: i32) -> (i32, i32) {
    %c0_i32 = arith.constant 0 : i32
    %c0_i32_0 = arith.constant 0 : i32
    return %arg0, %c0_i32 : i32, i32
  }
}

</mosaic_0001>

<bundles_post_ra>
// kernel: tpu_custom_call.1
= control target key start
LH: loop header
LB: loop body
LE: loop exit
PB: predicated region body
PF: predicated region fallthrough
CT: control target
= control target key end

     0   :  { %17 = vsyncpa [#allocation4], 0  ;;  %s2269_s0 = inlined_call_operand.vmem [shape: f32[16,32], index: 0, kind: input, shape index: {}]   ;;  %s2270_s1 = inlined_call_operand.vmem [shape: f32[2,32], index: 1, kind: input, shape index: {}]   ;;  %s2271_s2 = inlined_call_operand.vmem [shape: bf16[32,192], index: 2, kind: input, shape index: {}]   ;;  %s2272_s3 = inlined_call_operand.vmem [shape: f32[1,192], index: 3, kind: input, shape index: {}]   ;;  %s2273_s4 = inlined_call_operand.vmem [shape: bf16[32,96], index: 4, kind: input, shape index: {}]   ;;  %s2274_s5 = inlined_call_operand.vmem [shape: f32[1,96], index: 5, kind: input, shape index: {}]   ;;  %s2275_s6 = inlined_call_operand.vmem [shape: bf16[32,32], index: 6, kind: input, shape index: {}]   ;;  %s2276_s7 = inlined_call_operand.vmem [shape: f32[1,32], index: 7, kind: input, shape index: {}]   ;;  %s2277_s8 = inlined_call_operand.hbm [shape: bf16[32,128], index: 8, kind: input, shape index: {}]   ;;  %s2278_s9 = inlined_call_operand.vmem [shape: f32[1,128], index: 9, kind: input, shape index: {}]   ;;  %s2279_s10 = inlined_call_operand.vmem [shape: bf16[128,32], index: 10, kind: input, shape index: {}]   ;;  %s2280_s11 = inlined_call_operand.vmem [shape: f32[1,32], index: 11, kind: input, shape index: {}]   ;;  %s2281_s12 = inlined_call_operand.hbm [shape: f32[16,32], index: 12, kind: output, shape index: {}]  }
   0x1   :  { %18 = vsyncpa [#allocation5], 0 }
   0x2   :  { %20 = vsyncpa [#allocation5 + $0x1], 0  ;;  %s1933_s21 = smov 0   ;;  %s1935_s22 = smov 0  }
   0x3   :  { %s1937_s23 = smov 0   ;;  %s1939_s24 = smov 0  }
   0x4 LB: > { %2286 = sst [smem:[#allocation9_spill]] %s1840_s23  ;;  %s1954_s25 = sadd.s32 4294967295, %s1844_s24   ;;  %s1844_s24 = sphi %s1939_s24, %s2301_s24   ;;  %s1840_s23 = sphi %s1937_s23, %s2298_s23   ;;  %s1836_s22 = sphi %s1935_s22, %s2300_s22   ;;  %s1832_s21 = sphi %s1933_s21, %s2299_s21  }
   0x5   : > { %s1461_s26 = sadd.s32 4294967294, %s1844_s24   ;;  %s1958_s27 = sadd.s32 1, %s1844_s24  }
   0x6   : > { %s290_s28 = sadd.s32 1, %s1840_s23  ;;  %s287_s29 = ssub.s32 %s1844_s24, %s1958_s27 }
   0x7   : > { %p300_p0 = scmp.ne.s32.totalorder %s1840_s23, %s1836_s22  ;;  %p288_p1 = scmp.eq.s32.totalorder %s287_s29, 0 }
   0x8   : > { %p301_p2 = scmp.eq.s32.totalorder %s1954_s25, 1  ;;  %p306_p3 = scmp.ne.s32.totalorder %s1836_s22, %s1832_s21 }
   0x9   : > { %p307_p4 = scmp.eq.s32.totalorder %s1461_s26, 1  ;;  %p1462_p7 = scmp.ge.s32.totalorder %s1844_s24, 1 }
   0xa   : > { %s1969_s30 = scalar_select %p288_p1, %s1840_s23, %s290_s28  }
   0xb   : > { %p1971_p5 = por %p301_p2, %p300_p0  ;;  %p1975_p6 = por %p307_p4, %p306_p3 }
   0xc   : > { %2287 = sst [smem:[#allocation10_spill]] %s1969_s30  ;;  %p314_p8 = scmp.lt.s32.totalorder %s1844_s24, 3 }
   0xd   : > { %s2288_s13 = scalar_select %p1971_p5, 1, 0 }
   0xe   : > { %s2289_s14 = scalar_select %p1975_p6, 1, 0 }
   0xf   : > { %p2283_p9 = scmp.eq.s32.totalorder %s1954_s25, 0  ;;  %p1982_p10 = pnand %p1462_p7, %p314_p8 }
  0x10   : > { %s1846_s16 = smov [#allocation3]   ;;  %s1750_s26 = scalar_lea.hbm %s2277_s8, 256 }
  0x11   : > { %s2290_s15 = scalar_select %p1982_p10, 1, 0 }
  0x12   : > { %s347_s17 = sshll.u32 %s1846_s16, 4  ;;  %p1640_p11 = pneg %p1982_p10  ;;  %s348_s17 = int_to_ptr.vmem [resolvable:$true] %s347_s17 }
  0x13   : > { %p1751_p13 = scmp.ne.s32.totalorder %s2277_s8, %s1750_s26  ;;  %p1757_p3 = scmp.lt.u32.totalorder %s1750_s26, %s2277_s8 }
  0x14   : > { %p1990_p12 = pnand %p2283_p9, %p1640_p11 }
  0x16   : > { %p1752_p0 = pneg %p1990_p12 }
  0x18   : > { %p1753_p1 = pnand %p1752_p0, %p1751_p13 }
  0x1a   : > { %p1754_p2 = pneg %p1753_p1 }
  0x1c   : > { %p1759_p4 = pnand %p1757_p3, %p1754_p2 }
  0x1e   : > { %1762 = shalt.err (!%p1759_p4)
}
  0x1f   : > { %s1763_s23 = scalar_lea.vmem %s348_s17, 256  ;;  %p1771_p9 = scmp.lt.s32.totalorder %s348_s17, %s348_s17 }
  0x20   : > { %p1764_p7 = scmp.ne.s32.totalorder %s348_s17, %s1763_s23  ;;  %p1772_p6 = scmp.lt.s32.totalorder %s1763_s23, %s1763_s23 }
  0x22   : > { %p1766_p8 = pnand %p1764_p7, %p1752_p0  ;;  %p1773_p5 = por %p1772_p6, %p1771_p9 }
  0x24   : > { %p1767_p11 = pneg %p1766_p8 }
  0x26   : > { %p1774_p10 = pnand %p1773_p5, %p1767_p11 }
  0x28   : > { %1777 = shalt.err (!%p1774_p10)
}
  0x29   : > { %s1847_s19 = smov 64   ;;  %s1848_s20 = smov 4  }
  0x2a   : > { %1643 = dma.hbm_to_vmem [thread:$0]  (!%p1990_p12), %s2277_s8, 256, %s348_s17, [#allocation4], %s1847_s19, %s1847_s19, %s1848_s20  }
  0x2b   : > { %p2292_p13 = scmp.ne.s32.totalorder %s2290_s15, 0 }
  0x2c   : > { %p2293_p1 = scmp.eq.s32.totalorder (!%p2292_p13), %s1954_s25, 0 }
  0x2d   : > { %379 = sbr.rel (%p2292_p13) target bundleno = 3153 (0xc51), region = 68 }
  0x34   : > { %1823 = dma.done.wait (%p2293_p1), [#allocation4], 256   ;;  %p2294_p0 = pmov %p2293_p1 }
  0x35   : > { %p420_p5 = scmp.lt.s32.totalorder %s1954_s25, 1  ;;  %v1849_v0 = vmov 0   ;;  %vm472_vm0 = vcmask 261120   ;;  %s426_s19 = scalar_lea.vmem %s2270_s1, %s1954_s25  ;;  %v1704_v3 = vld [vmem:[%s2271_s2 + $0x4] ss:$8 sps:$4 sm:$0xff]   ;;  %v1850_v20 = vmov 0.0   ;;  %v462_v21 = vlaneseq }
  0x36   : > { %1825 = vsyncadd (%p2294_p0), [#allocation4], 4294967040  ;;  %508 = vmatprep.mubr.bf16.mxu1 %v1849_v0  ;;  %v1706_v4 = vld [vmem:[%s2271_s2] ss:$8 sps:$4 sm:$0xff]   ;;  %v1707_v5 = vld [vmem:[%s2271_s2 + $0x14] ss:$8 sps:$4 sm:$0xff]   ;;  %476 = vmatprep.subr.bf16.mxu1 %v1704_v3 }
  0x37   : > { %s421_s23 = scalar_select %p420_p5, %s1954_s25, 1  ;;  %v1709_v6 = vld [vmem:[%s2271_s2 + $0x10] ss:$8 sps:$4 sm:$0xff]   ;;  %v427_v7 = vld [vmem:[%s426_s19] sm:$0x1]  ;;  %477 = vmatpush1.bf16.msra.mxu1 %v1706_v4  ;;  %1562 = vmatprep.subr.bf16.mxu0 %v1850_v20  ;;  %v2050_v22 = vshrl.u32 %v462_v21, 7 }
  0x38   : > { %v1469_v8 = vmul.f32 -1.442695, %v427_v7  ;;  %478 = vmatprep.subr.bf16.mxu1 %v1707_v5  ;;  %v1710_v19 = vld [vmem:[%s2273_s4] sm:$0xff]   ;;  %v1711_v25 = vld [vmem:[%s2273_s4 + $0x8] sm:$0xff]   ;;  %vm1851_vm1 = vmmov 0   ;;  %s1853_s26 = smov 88  }
  0x39   : > { %s1468_s30 = sshll.u32 %s421_s23, 3  ;;  %v2053_v23 = vsub.s32 0, %v2050_v22  ;;  %v2058_v24 = vld [vmem:[%s2272_s3] sm:$0x3]  ;;  %1564 = vmatprep.mubr.msk.bf16.mxu0 %vm1851_vm1, %v1850_v20  ;;  %s1852_s23 = smov 96   ;;  %vm613_vm2 = vcmask 64512  }
  0x3a   : > { %s423_s17 = scalar_lea.vmem %s2269_s0, %s1468_s30  ;;  %1724 = vpow2.f32 %v1469_v8  ;;  %v1475_v43 = vld [vmem:[%s2274_s5] ss:$0 sm:$0xff]  ;;  %s1855_s15 = smov 80   ;;  %vm678_vm3 = vcmask 1043456   ;;  %vm838_vm4 = vcmask 130112   ;;  %vm955_vm5 = vcmask 195712  }
  0x3b   : > { %v2021_v1 = vld [vmem:[%s423_s17] sm:$0xff]  ;;  %479 = vmatpush1.bf16.msra.mxu1 %v1709_v6  ;;  %v465_v26 = vrot.slane %v2058_v24, %v2053_v23  ;;  %s1854_s17 = smov 120   ;;  %s1856_s16 = smov 112   ;;  %vm1072_vm6 = vcmask 261312  }
  0x3c   : > { %v522_v2 = vsel %vm472_vm0, %v2021_v1, 0.0  ;;  %1542 = vmatprep.subr.bf16.mxu1 %v1850_v20  ;;  %s1857_s19 = smov 72   ;;  %s1858_s20 = smov 104  }
  0x3d   : > { %523 = vadd.xlane.f32.xlu0 %v522_v2  ;;  %s1859_s28 = smov 56   ;;  %s1860_s29 = smov 64  }
  0x3e   : > { %s1861_s30 = smov 40   ;;  %s1862_s18 = smov 48  }
  0x3f   : > { %p2295_p9 = scmp.ne.s32.totalorder %s2288_s13, 0 }
  0x44   : > { %v1725_v9 = vpop.eup %1724 }
  0x45   : > { %v431_v10 = vadd.f32 1.0, %v1725_v9 }
  0x47   : > { %1726 = vrcp.f32 %v431_v10 }
  0x51   : > { %v1727_v11 = vpop.eup %1726 }
  0x52   : > { %v434_v12 = vmul.f32 %v1727_v11, %v427_v7 }
  0x54   : > { %v435_v13 = vpack.c.bf16 %v434_v12, %v434_v12 }
  0x56   : > { %1474 = vmatmul.mubr.msk.bf16.vlgmr.msra.gmra.mrb[0].mxu1 %vm472_vm0, %v435_v13 }
  0x57   : > { %1543 = vmatpush3.bf16.msra.mxu1 %v1710_v19  ;;  %1546 = vmatprep.mubr.msk.bf16.mxu1 %vm1851_vm1, %v1850_v20 }
  0x58   : > { %1544 = vmatprep.subr.bf16.mxu1 %v1850_v20 }
  0x5b   : > { %1545 = vmatpush3.bf16.msra.mxu1 %v1711_v25 }
  0x5c   : > { %1550 = vmatprep.subr.bf16.mxu1 %v1850_v20 }
  0xca   : > { %v524_v14 = vpop.xlane.xlu0 %523 }
  0xcb   : > { %v526_v15 = vmul.f32 0.03125, %v524_v14 }
  0xcd   : > { %v527_v16 = vsub.f32 %v2021_v1, %v526_v15 }
  0xcf   : > { %v528_v17 = vmul.f32 %v527_v16, %v527_v16 }
  0xd1   : > { %v529_v18 = vsel %vm472_vm0, %v528_v17, 0.0 }
  0xd2   : > { %530 = vadd.xlane.f32.xlu0 %v529_v18 }
 0x129   : > { %v510_v27 = vpop.f32.mrb[0].mxu1 }
 0x12a   : > { %v511_v28 = vadd.f32 %v510_v27, %v465_v26  ;;  %v2070_v29 = vpop.f32.mrb[1].mxu1 }
 0x12b   : > { %v514_v30 = vpop.f32.mrb[2].mxu1 }
 0x12c   : > { %v2073_v31 = vrot.slane %v511_v28, %v2053_v23  ;;  %v515_v32 = vpop.f32.mrb[3].mxu1 }
 0x12e   : > { %v521_v33 = vadd.f32 1.0, %v2073_v31 }
 0x130   : > { %537 = vrot.lane.b32.xlu1 %v521_v33, %s1852_s23 }
 0x15f   : > { %v531_v34 = vpop.xlane.xlu0 %530 }
 0x160   : > { %v532_v35 = vmul.f32 0.03125, %v531_v34 }
 0x162   : > { %v533_v36 = vadd.f32 1e-06, %v532_v35 }
 0x164   : > { %1728 = vrsqrt.f32 %v533_v36 }
 0x16e   : > { %v1729_v37 = vpop.eup %1728 }
 0x16f   : > { %v535_v38 = vmul.f32 %v1729_v37, %v527_v16 }
 0x1a2   : > { %v538_v39 = vpop.permute.xlu1 %537 }
 0x1a3   : > { %v540_v40 = vmul.f32 %v538_v39, %v535_v38 }
 0x1a5   : > { %v541_v41 = vadd.f32 %v540_v40, %v2073_v31 }
 0x1a7   : > { %v542_v42 = vpack.c.bf16 %v541_v41, %v541_v41 }
 0x1a9   : > { %1547 = vmatmul.mubr.msk.bf16.vlgmr.msra.gmra.mrb[4].mxu1 %vm472_vm0, %v542_v42 }
 0x1aa   : > { %1552 = vmatprep.mubr.msk.bf16.mxu1 %vm1851_vm1, %v1850_v20 }
 0x27c   : > { %v603_v44 = vpop.f32.mrb[4].mxu1 }
 0x27d   : > { %v604_v45 = vadd.f32 %v1475_v43, %v603_v44  ;;  %v1548_v46 = vpop.f32.mrb[5].mxu1 }
 0x27e   : > { %v606_v47 = vpop.f32.mrb[6].mxu1 }
 0x27f   : > { %v2084_v48 = vpack.c.bf16 %v604_v45, %v604_v45  ;;  %v1549_v49 = vpop.f32.mrb[7].mxu1 }
 0x281   : > { %725 = vrot.lane.b32.xlu0 %v2084_v48, %s1853_s26  ;;  %611 = vrot.lane.b32.xlu1 %v2084_v48, %s1852_s23  ;;  %s1863_s26 = smov 8  }
 0x285   : > { %723 = vrot.lane.b32.xlu1 %v2084_v48, %s1854_s17 }
 0x289   : > { %842 = vrot.lane.b32.xlu1 %v2084_v48, %s1855_s15  ;;  %s417_s15 = sand.u32 1, %s1836_s22  }
 0x28d   : > { %840 = vrot.lane.b32.xlu1 %v2084_v48, %s1856_s16  ;;  %s1467_s16 = sshll.u32 %s417_s15, 3 }
 0x291   : > { %959 = vrot.lane.b32.xlu1 %v2084_v48, %s1857_s19  ;;  %s1505_s19 = sshll.u32 %s1954_s25, 7  ;;  %s1867_s25 = smov [#allocation6]  }
 0x292   : > { %s1782_s17 = sshll.u32 %s1867_s25, 4  ;;  %s1783_s17 = int_to_ptr.vmem [resolvable:$false] %s1782_s17 }
 0x295   : > { %957 = vrot.lane.b32.xlu1 %v2084_v48, %s1858_s20  ;;  %s1864_s20 = smov 16  }
 0x2f3   : > { %v726_v50 = vpop.permute.xlu0 %725  ;;  %v612_v51 = vpop.permute.xlu1 %611 }
 0x2f4   : > { %v618_v52 = vsel %vm613_vm2, %v612_v51, 0  ;;  %v731_v53 = vsel %vm613_vm2, %v726_v50, 0 }
 0x2f5   : > { %1551 = vmatpush3.bf16.xpose.msra.mxu1 %v618_v52  ;;  %1563 = vmatpush3.bf16.xpose.msra.mxu0 %v731_v53 }
 0x2f6   : > { %1574 = vmatprep.subr.bf16.mxu0 %v1850_v20  ;;  %1556 = vmatprep.subr.bf16.mxu1 %v1850_v20 }
 0x2f7   : > { %v724_v54 = vpop.permute.xlu1 %723 }
 0x2fb   : > { %v843_v55 = vpop.permute.xlu1 %842 }
 0x2fc   : > { %v848_v56 = vsel %vm613_vm2, %v843_v55, 0  ;;  %1553 = vmatmul.mubr.msk.bf16.vlgmr.msra.gmra.mrb[8].mxu1 %vm613_vm2, %v2084_v48  ;;  %1565 = vmatmul.mubr.msk.bf16.vlgmr.msra.gmra.mrb[0].mxu0 %vm613_vm2, %v724_v54 }
 0x2fd   : > { %1575 = vmatpush3.bf16.xpose.msra.mxu0 %v848_v56  ;;  %1576 = vmatprep.mubr.msk.bf16.mxu0 %vm1851_vm1, %v1850_v20 }
 0x2fe   : > { %1586 = vmatprep.subr.bf16.mxu0 %v1850_v20  ;;  %1558 = vmatprep.mubr.msk.bf16.mxu1 %vm1851_vm1, %v1850_v20 }
 0x2ff   : > { %v841_v57 = vpop.permute.xlu1 %840 }
 0x303   : > { %v960_v58 = vpop.permute.xlu1 %959 }
 0x304   : > { %v965_v59 = vsel %vm613_vm2, %v960_v58, 0  ;;  %1577 = vmatmul.mubr.msk.bf16.vlgmr.msra.gmra.mrb[4].mxu0 %vm613_vm2, %v841_v57 }
 0x305   : > { %1587 = vmatpush3.bf16.xpose.msra.mxu0 %v965_v59  ;;  %1588 = vmatprep.mubr.msk.bf16.mxu0 %vm1851_vm1, %v1850_v20 }
 0x306   : > { %1598 = vmatprep.subr.bf16.mxu0 %v1850_v20 }
 0x307   : > { %v958_v60 = vpop.permute.xlu1 %957 }
 0x30c   : > { %1589 = vmatmul.mubr.msk.bf16.vlgmr.msra.gmra.mrb[8].mxu0 %vm613_vm2, %v958_v60 }
 0x30d   : > { %1602 = vmatprep.mubr.msk.bf16.mxu0 %vm1851_vm1, %v1850_v20 }
 0x3cf   : > { %v654_v61 = vpop.f32.mrb[8].mxu1  ;;  %v767_v62 = vpop.f32.mrb[0].mxu0 }
 0x3d0   : > { %v660_v63 = vmul.f32 0.35355338, %v654_v61  ;;  %v773_v0 = vmul.f32 0.35355338, %v767_v62  ;;  %v1554_v2 = vpop.f32.mrb[9].mxu1  ;;  %v1566_v3 = vpop.f32.mrb[1].mxu0 }
 0x3d1   : > { %v657_v4 = vpop.f32.mrb[10].mxu1  ;;  %v770_v5 = vpop.f32.mrb[2].mxu0 }
 0x3d2   : > { %v1555_v6 = vpop.f32.mrb[11].mxu1  ;;  %v1567_v7 = vpop.f32.mrb[3].mxu0  ;;  %v774_v8 = vsel %vm613_vm2, %v773_v0, -inf  ;;  %v661_v9 = vsel %vm613_vm2, %v660_v63, -inf }
 0x3d3   : > { %775 = vmax.xlane.f32.xlu0 %v774_v8  ;;  %662 = vmax.xlane.f32.xlu1 %v661_v9 }
 0x3d7   : > { %v884_v10 = vpop.f32.mrb[4].mxu0 }
 0x3d8   : > { %v890_v11 = vmul.f32 0.35355338, %v884_v10  ;;  %v1578_v12 = vpop.f32.mrb[5].mxu0 }
 0x3d9   : > { %v887_v13 = vpop.f32.mrb[6].mxu0 }
 0x3da   : > { %v1579_v14 = vpop.f32.mrb[7].mxu0  ;;  %v891_v15 = vsel %vm613_vm2, %v890_v11, -inf }
 0x3db   : > { %892 = vmax.xlane.f32.xlu0 %v891_v15 }
 0x3df   : > { %v1001_v16 = vpop.f32.mrb[8].mxu0 }
 0x3e0   : > { %v1007_v17 = vmul.f32 0.35355338, %v1001_v16  ;;  %v1590_v18 = vpop.f32.mrb[9].mxu0 }
 0x3e1   : > { %v1004_v19 = vpop.f32.mrb[10].mxu0  ;;  %v1713_v18 = vld [vmem:[%s2275_s6 + $0x8] sm:$0xff]  }
 0x3e2   : > { %v1591_v21 = vpop.f32.mrb[11].mxu0  ;;  %v1008_v25 = vsel %vm613_vm2, %v1007_v17, -inf }
 0x3e3   : > { %1009 = vmax.xlane.f32.xlu1 %v1008_v25 }
 0x460   : > { %v776_v26 = vpop.xlane.xlu0 %775  ;;  %v663_v27 = vpop.xlane.xlu1 %662 }
 0x461   : > { %v777_v28 = vsub.f32 %v773_v0, %v776_v26  ;;  %v664_v30 = vsub.f32 %v660_v63, %v663_v27 }
 0x463   : > { %v778_v32 = vmul.f32 1.442695, %v777_v28  ;;  %v665_v33 = vmul.f32 1.442695, %v664_v30 }
 0x465   : > { %1730 = vpow2.f32 %v778_v32 }
 0x466   : > { %1732 = vpow2.f32 %v665_v33 }
 0x468   : > { %v893_v34 = vpop.xlane.xlu0 %892 }
 0x469   : > { %v894_v35 = vsub.f32 %v890_v11, %v893_v34 }
 0x46b   : > { %v895_v36 = vmul.f32 1.442695, %v894_v35 }
 0x46d   : > { %1734 = vpow2.f32 %v895_v36 }
 0x46f   : > { %v1731_v37 = vpop.eup %1730 }
 0x470   : > { %v1733_v38 = vpop.eup %1732  ;;  %v780_v39 = vsel %vm613_vm2, %v1731_v37, 0.0  ;;  %v1010_v43 = vpop.xlane.xlu1 %1009 }
 0x471   : > { %781 = vadd.xlane.f32.xlu1 %v780_v39  ;;  %v667_v40 = vsel %vm613_vm2, %v1733_v38, 0.0  ;;  %v1011_v44 = vsub.f32 %v1007_v17, %v1010_v43  ;;  %v1712_v17 = vld [vmem:[%s2275_s6] sm:$0xff]  }
 0x472   : > { %668 = vadd.xlane.f32.xlu0 %v667_v40  ;;  %1599 = vmatpush3.bf16.msra.mxu0 %v1712_v17 }
 0x473   : > { %v1012_v45 = vmul.f32 1.442695, %v1011_v44  ;;  %1600 = vmatprep.subr.bf16.mxu0 %v1850_v20 }
 0x475   : > { %1736 = vpow2.f32 %v1012_v45 }
 0x476   : > { %1601 = vmatpush3.bf16.msra.mxu0 %v1713_v18 }
 0x477   : > { %v1735_v41 = vpop.eup %1734  ;;  %1614 = vmatprep.subr.bf16.mxu0 %v1850_v20 }
 0x478   : > { %v897_v42 = vsel %vm613_vm2, %v1735_v41, 0.0 }
 0x479   : > { %898 = vadd.xlane.f32.xlu0 %v897_v42 }
 0x47f   : > { %v1737_v46 = vpop.eup %1736 }
 0x480   : > { %v1014_v47 = vsel %vm613_vm2, %v1737_v46, 0.0 }
 0x482   : > { %786 = vrot.lane.b32.xlu1 %v2084_v48, %s1859_s28  ;;  %s1865_s28 = smov 24  }
 0x48f   : > { %673 = vrot.lane.b32.xlu0 %v2084_v48, %s1860_s29 }
 0x493   : > { %1020 = vrot.lane.b32.xlu0 %v2084_v48, %s1861_s30 }
 0x4a6   : > { %1015 = vadd.xlane.f32.xlu1 %v1014_v47 }
 0x4b7   : > { %903 = vrot.lane.b32.xlu1 %v2084_v48, %s1862_s18 }
 0x4fe   : > { %v782_v50 = vpop.xlane.xlu1 %781 }
 0x4ff   : > { %v669_v49 = vpop.xlane.xlu0 %668 }
 0x500   : > { %1738 = vrcp.f32 %v669_v49 }
 0x501   : > { %1740 = vrcp.f32 %v782_v50 }
 0x502   : > { %v787_v56 = vpop.permute.xlu1 %786 }
 0x503   : > { %v792_v59 = vsel %vm678_vm3, %v787_v56, 0  ;;  %v468_v56 = vsub.s32 1, %v2050_v22  ;;  %v1716_v22 = vld [vmem:[%s2279_s10] sm:$0xff]  }
 0x506   : > { %v899_v51 = vpop.xlane.xlu0 %898 }
 0x507   : > { %1742 = vrcp.f32 %v899_v51 }
 0x50a   : > { %v1739_v52 = vpop.eup %1738  ;;  %v674_v53 = vpop.permute.xlu0 %673 }
 0x50b   : > { %v671_v54 = vmul.f32 %v1739_v52, %v1733_v38  ;;  %v680_v55 = vsel %vm678_vm3, %v674_v53, 0  ;;  %v1741_v58 = vpop.eup %1740  ;;  %v1487_v38 = vld [vmem:[%s2276_s7] ss:$0 sm:$0xff] }
 0x50c   : > { %1557 = vmatpush3.bf16.msra.mxu1 %v680_v55  ;;  %v784_v48 = vmul.f32 %v1741_v58, %v1731_v37  ;;  %v1714_v55 = vld [vmem:[#allocation3] sm:$0xff]  }
 0x50d   : > { %v672_v57 = vpack.c.bf16 %v671_v54, %v671_v54  ;;  %1568 = vmatprep.subr.bf16.mxu1 %v1850_v20 }
 0x50e   : > { %v785_v60 = vpack.c.bf16 %v784_v48, %v784_v48  ;;  %v1021_v3 = vpop.permute.xlu0 %1020 }
 0x50f   : > { %1559 = vmatmul.mubr.msk.bf16.vlgmr.msra.gmra.mrb[12].mxu1 %vm613_vm2, %v672_v57  ;;  %v1026_v5 = vsel %vm678_vm3, %v1021_v3, 0 }
 0x510   : > { %1569 = vmatpush3.bf16.msra.mxu1 %v792_v59  ;;  %1570 = vmatprep.mubr.msk.bf16.mxu1 %vm1851_vm1, %v1850_v20 }
 0x511   : > { %1580 = vmatprep.subr.bf16.mxu1 %v1850_v20  ;;  %v1743_v61 = vpop.eup %1742 }
 0x512   : > { %v901_v63 = vmul.f32 %v1743_v61, %v1735_v41 }
 0x514   : > { %v902_v4 = vpack.c.bf16 %v901_v63, %v901_v63 }
 0x517   : > { %1571 = vmatmul.mubr.msk.bf16.vlgmr.msra.gmra.mrb[16].mxu1 %vm613_vm2, %v785_v60 }
 0x518   : > { %1582 = vmatprep.mubr.msk.bf16.mxu1 %vm1851_vm1, %v1850_v20 }
 0x533   : > { %v1016_v62 = vpop.xlane.xlu1 %1015 }
 0x534   : > { %1744 = vrcp.f32 %v1016_v62 }
 0x537   : > { %v904_v0 = vpop.permute.xlu1 %903 }
 0x538   : > { %v909_v2 = vsel %vm678_vm3, %v904_v0, 0 }
 0x539   : > { %1581 = vmatpush3.bf16.msra.mxu1 %v909_v2 }
 0x53a   : > { %1592 = vmatprep.subr.bf16.mxu1 %v1850_v20 }
 0x53c   : > { %1583 = vmatmul.mubr.msk.bf16.vlgmr.msra.gmra.mrb[20].mxu1 %vm613_vm2, %v902_v4 }
 0x53d   : > { %1593 = vmatpush3.bf16.msra.mxu1 %v1026_v5  ;;  %1594 = vmatprep.mubr.msk.bf16.mxu1 %vm1851_vm1, %v1850_v20  ;;  %v1720_v5 = vld [vmem:[%s2279_s10 + $0x20] sm:$0xff]  }
 0x53e   : > { %v1745_v6 = vpop.eup %1744  ;;  %1606 = vmatprep.subr.bf16.mxu1 %v1850_v20 }
 0x53f   : > { %v1018_v7 = vmul.f32 %v1745_v6, %v1737_v46  ;;  %v1721_v6 = vld [vmem:[%s2279_s10 + $0x28] sm:$0xff]  }
 0x541   : > { %v1019_v8 = vpack.c.bf16 %v1018_v7, %v1018_v7  ;;  %v1722_v7 = vld [vmem:[%s2279_s10 + $0x30] sm:$0xff]  }
 0x544   : > { %1595 = vmatmul.mubr.msk.bf16.vlgmr.msra.gmra.mrb[24].mxu1 %vm613_vm2, %v1019_v8  ;;  %v1723_v8 = vld [vmem:[%s2279_s10 + $0x38] sm:$0xff]  }
 0x545   : > { %1610 = vmatprep.mubr.msk.bf16.mxu1 %vm1851_vm1, %v1850_v20  ;;  %1607 = vmatpush3.bf16.msra.mxu1 %v1714_v55 }
 0x546   : > { %1608 = vmatprep.subr.bf16.mxu1 %v1850_v20 }
 0x5e2   : > { %v716_v9 = vpop.f32.mrb[12].mxu1 }
 0x5e3   : > { %722 = vst.msk [vmem:[#allocation2] sm:$0xff] %vm613_vm2, %v716_v9  ;;  %v1560_v10 = vpop.f32.mrb[13].mxu1  ;;  %v1491_v9 = vld [vmem:[%s2278_s9] ss:$0 sm:$0xff] }
 0x5e4   : > { %v719_v11 = vpop.f32.mrb[14].mxu1 }
 0x5e5   : > { %v1561_v12 = vpop.f32.mrb[15].mxu1 }
 0x5ea   : > { %v828_v13 = vpop.f32.mrb[16].mxu1 }
 0x5eb   : > { %835 = vrot.lane.b32.xlu1 %v828_v13, %s1863_s26  ;;  %v1572_v14 = vpop.f32.mrb[17].mxu1  ;;  %s1866_s26 = smov 32  }
 0x5ec   : > { %v831_v15 = vpop.f32.mrb[18].mxu1 }
 0x5ed   : > { %v1573_v16 = vpop.f32.mrb[19].mxu1 }
 0x60f   : > { %v945_v19 = vpop.f32.mrb[20].mxu1 }
 0x610   : > { %952 = vrot.lane.b32.xlu0 %v945_v19, %s1864_s20  ;;  %v1584_v21 = vpop.f32.mrb[21].mxu1  ;;  %s419_s20 = scalar_lea.vmem [#allocation6], %s1467_s16  ;;  %s1784_s16 = scalar_lea.vmem %s1783_s17, 256 }
 0x611   : > { %v948_v25 = vpop.f32.mrb[22].mxu1 }
 0x612   : > { %v1585_v26 = vpop.f32.mrb[23].mxu1 }
 0x617   : > { %v1062_v27 = vpop.f32.mrb[24].mxu1 }
 0x618   : > { %1069 = vrot.lane.b32.xlu1 %v1062_v27, %s1865_s28  ;;  %v1596_v28 = vpop.f32.mrb[25].mxu1  ;;  %s1389_s28 = sshll.u32 %s419_s20, 4  ;;  %s2228_s28 = int_to_ptr.vmem [resolvable:$true] %s1389_s28 }
 0x619   : > { %v1065_v30 = vpop.f32.mrb[26].mxu1  ;;  %v1495_v28 = vld [vmem:[%s2280_s11] ss:$0 sm:$0xff]  ;;  %p1785_p2 = scmp.lt.s32.totalorder %s2228_s28, %s1783_s17 }
 0x61a   : > { %v1597_v32 = vpop.f32.mrb[27].mxu1 }
 0x65d   : > { %v836_v33 = vpop.permute.xlu1 %835 }
 0x65e   : > { %839 = vst.msk [vmem:[#allocation2] sm:$0xff] %vm838_vm4, %v836_v33 }
 0x682   : > { %v953_v34 = vpop.permute.xlu0 %952 }
 0x683   : > { %956 = vst.msk [vmem:[#allocation2] sm:$0xff] %vm955_vm5, %v953_v34 }
 0x68a   : > { %v1070_v35 = vpop.permute.xlu1 %1069 }
 0x68b   : > { %1073 = vst.msk [vmem:[#allocation2] sm:$0xff] %vm1072_vm6, %v1070_v35 }
 0x692   : > { %v1074_v36 = vld [vmem:[#allocation2] sm:$0xff] }
 0x693   : > { %v1075_v37 = vpack.c.bf16 %v1074_v36, %v1074_v36 }
 0x695   : > { %1603 = vmatmul.mubr.msk.bf16.vlgmr.msra.gmra.mrb[12].mxu0 %vm472_vm0, %v1075_v37 }
 0x696   : > { %1630 = vmatprep.mubr.msk.bf16.mxu0 %vm1851_vm1, %v1850_v20  ;;  %1615 = vmatpush3.bf16.msra.mxu0 %v1716_v22 }
 0x697   : > { %1616 = vmatprep.subr.bf16.mxu0 %v1850_v20 }
 0x768   : > { %v1136_v39 = vpop.f32.mrb[12].mxu0 }
 0x769   : > { %v1137_v40 = vadd.f32 %v1487_v38, %v1136_v39  ;;  %v1604_v41 = vpop.f32.mrb[13].mxu0 }
 0x76a   : > { %v1139_v42 = vpop.f32.mrb[14].mxu0 }
 0x76b   : > { %1143 = vrot.lane.b32.xlu0 %v1137_v40, %s1860_s29  ;;  %v1605_v43 = vpop.f32.mrb[15].mxu0 }
 0x7dd   : > { %v1144_v44 = vpop.permute.xlu0 %1143 }
 0x7de   : > { %v1146_v45 = vmul.f32 %v1144_v44, %v2073_v31 }
 0x7e0   : > { %1148 = vrot.lane.b32.xlu1 %v1146_v45, %s1860_s29  ;;  %s2226_s29 = scalar_lea.hbm %s2281_s12, %s1505_s19 }
 0x852   : > { %v1149_v46 = vpop.permute.xlu1 %1148 }
 0x853   : > { %v2167_v47 = vadd.f32 %v1149_v46, %v2021_v1  ;;  %v1715_v1 = vld [vmem:[#allocation3 + $0x8] sm:$0xff]  }
 0x854   : > { %1609 = vmatpush3.bf16.msra.mxu1 %v1715_v1 }
 0x855   : > { %v1157_v49 = vsel %vm472_vm0, %v2167_v47, 0.0 }
 0x856   : > { %1158 = vadd.xlane.f32.xlu0 %v1157_v49 }
 0x86c   : > { %1172 = vrot.lane.b32.xlu0 %v2073_v31, %s1866_s26  ;;  %v469_v31 = vrot.slane %v2058_v24, %v468_v56  ;;  %v1718_v24 = vld [vmem:[%s2279_s10 + $0x10] sm:$0xff]  }
 0x86e   : > { %v513_v48 = vadd.f32 %v2070_v29, %v469_v31  ;;  %v1719_v29 = vld [vmem:[%s2279_s10 + $0x18] sm:$0xff]  }
 0x870   : > { %v1155_v60 = vrot.slane %v513_v48, %v2053_v23  ;;  %v1717_v23 = vld [vmem:[%s2279_s10 + $0x8] sm:$0xff]  }
 0x871   : > { %1617 = vmatpush3.bf16.msra.mxu0 %v1717_v23 }
 0x872   : > { %v1156_v62 = vadd.f32 1.0, %v1155_v60  ;;  %1618 = vmatprep.subr.bf16.mxu0 %v1850_v20 }
 0x875   : > { %1619 = vmatpush3.bf16.msra.mxu0 %v1718_v24 }
 0x876   : > { %1620 = vmatprep.subr.bf16.mxu0 %v1850_v20 }
 0x879   : > { %1621 = vmatpush3.bf16.msra.mxu0 %v1719_v29 }
 0x87a   : > { %1622 = vmatprep.subr.bf16.mxu0 %v1850_v20 }
 0x87d   : > { %1623 = vmatpush3.bf16.msra.mxu0 %v1720_v5 }
 0x87e   : > { %1624 = vmatprep.subr.bf16.mxu0 %v1850_v20 }
 0x881   : > { %1625 = vmatpush3.bf16.msra.mxu0 %v1721_v6 }
 0x882   : > { %1626 = vmatprep.subr.bf16.mxu0 %v1850_v20 }
 0x885   : > { %1627 = vmatpush3.bf16.msra.mxu0 %v1722_v7 }
 0x886   : > { %1628 = vmatprep.subr.bf16.mxu0 %v1850_v20 }
 0x889   : > { %1629 = vmatpush3.bf16.msra.mxu0 %v1723_v8 }
 0x8e3   : > { %v1159_v50 = vpop.xlane.xlu0 %1158 }
 0x8e4   : > { %v1160_v51 = vmul.f32 0.03125, %v1159_v50 }
 0x8e6   : > { %v1161_v52 = vsub.f32 %v2167_v47, %v1160_v51 }
 0x8e7   : > { %v1173_v2 = vpop.permute.xlu0 %1172 }
 0x8e8   : > { %v1162_v53 = vmul.f32 %v1161_v52, %v1161_v52 }
 0x8ea   : > { %v1163_v54 = vsel %vm472_vm0, %v1162_v53, 0.0 }
 0x8eb   : > { %1164 = vadd.xlane.f32.xlu1 %v1163_v54 }
 0x978   : > { %v1165_v57 = vpop.xlane.xlu1 %1164 }
 0x979   : > { %v1166_v58 = vmul.f32 0.03125, %v1165_v57 }
 0x97b   : > { %v1167_v59 = vadd.f32 1e-06, %v1166_v58 }
 0x97d   : > { %1746 = vrsqrt.f32 %v1167_v59 }
 0x987   : > { %v1747_v61 = vpop.eup %1746 }
 0x988   : > { %v1169_v63 = vmul.f32 %v1747_v61, %v1161_v52 }
 0x98a   : > { %v1170_v0 = vmul.f32 %v1169_v63, %v1156_v62 }
 0x98c   : > { %v1175_v3 = vadd.f32 %v1173_v2, %v1170_v0 }
 0x98e   : > { %v1176_v4 = vpack.c.bf16 %v1175_v3, %v1175_v3 }
 0x990   : > { %1611 = vmatmul.mubr.msk.bf16.vlgmr.msra.gmra.mrb[28].mxu1 %vm472_vm0, %v1176_v4 }
 0xa63   : > { %v1237_v10 = vpop.f32.mrb[28].mxu1 }
 0xa64   : > { %v1238_v11 = vadd.f32 %v1491_v9, %v1237_v10  ;;  %v1612_v12 = vpop.f32.mrb[29].mxu1 }
 0xa65   : > { %v1240_v13 = vpop.f32.mrb[30].mxu1 }
 0xa66   : > { %v1243_v14 = vmul.f32 %v1238_v11, %v1238_v11  ;;  %v1613_v15 = vpop.f32.mrb[31].mxu1 }
 0xa68   : > { %v1244_v16 = vmul.f32 %v1243_v14, %v1238_v11 }
 0xa6a   : > { %v1245_v17 = vmul.f32 0.044715, %v1244_v16 }
 0xa6c   : > { %v1246_v18 = vadd.f32 %v1245_v17, %v1238_v11 }
 0xa6e   : > { %v1247_v19 = vmul.f32 0.7978846, %v1246_v18 }
 0xa70   : > { %1748 = vtanh.f32 %v1247_v19 }
 0xa7a   : > { %v1749_v21 = vpop.eup %1748 }
 0xa7b   : > { %v1249_v25 = vadd.f32 1.0, %v1749_v21 }
 0xa7d   : > { %v1250_v20 = vmul.f32 0.5, %v1249_v25 }
 0xa7f   : > { %v1251_v26 = vmul.f32 %v1250_v20, %v1238_v11 }
 0xa81   : > { %v1252_v27 = vpack.c.bf16 %v1251_v26, %v1251_v26 }
 0xa83   : > { %1631 = vmatmul.mubr.bf16.vlgmr.msra.gmra.mrb[16].mxu0 %v1252_v27 }
 0xb56   : > { %v1358_v30 = vpop.f32.mrb[16].mxu0 }
 0xb57   : > { %v1359_v32 = vadd.f32 %v1495_v28, %v1358_v30  ;;  %v1632_v33 = vpop.f32.mrb[17].mxu0 }
 0xb58   : > { %v1361_v34 = vpop.f32.mrb[18].mxu0 }
 0xb59   : > { %1365 = vrot.lane.b32.xlu1 %v1359_v32, %s1866_s26  ;;  %v1633_v35 = vpop.f32.mrb[19].mxu0  ;;  %s1778_s26 = scalar_lea.vmem %s2228_s28, 128 }
 0xb5a   : > { %p1779_p6 = scmp.ne.s32.totalorder %s2228_s28, %s1778_s26  ;;  %p1786_p3 = scmp.lt.s32.totalorder %s1784_s16, %s1778_s26 }
 0xb5c   : > { %p1780_p10 = pnand %p1779_p6, %p2295_p9  ;;  %p1787_p4 = por %p1786_p3, %p1785_p2 }
 0xb5e   : > { %p1781_p12 = pneg %p1780_p10 }
 0xb60   : > { %p1788_p7 = pnand %p1787_p4, %p1781_p12 }
 0xbcb   : > { %v1366_v36 = vpop.permute.xlu1 %1365 }
 0xbcc   : > { %v1368_v37 = vmul.f32 %v1366_v36, %v1155_v60 }
 0xbce   : > { %1370 = vrot.lane.b32.xlu0 %v1368_v37, %s1852_s23  ;;  %s1376_s23 = scalar_lea.sflag [#allocation5], %s417_s15 }
 0xc40   : > { %v1371_v38 = vpop.permute.xlu0 %1370 }
 0xc41   : > { %v1373_v39 = vadd.f32 %v1371_v38, %v2167_v47 }
 0xc43   : > { %1374 = vst.msk [vmem:[%s419_s20] sm:$0xff] %vm472_vm0, %v1373_v39 }
 0xc44   : > { %1791 = shalt.err (!%p1788_p7)
}
 0xc45   : > { %s1792_s15 = scalar_lea.hbm %s2226_s29, 128  ;;  %s1796_s30 = scalar_lea.hbm %s2281_s12, 256 }
 0xc46   : > { %p1793_p8 = scmp.ne.s32.totalorder %s2226_s29, %s1792_s15  ;;  %p1797_p1 = scmp.lt.u32.totalorder %s2226_s29, %s2281_s12 }
 0xc47   : > { %p1798_p0 = scmp.lt.u32.totalorder %s1796_s30, %s1792_s15  ;;  %p1800_p6 = scmp.lt.u32.totalorder %s1792_s15, %s2226_s29 }
 0xc48   : > { %p1794_p11 = pnand %p1793_p8, %p2295_p9 }
 0xc49   : > { %p1799_p5 = por %p1798_p0, %p1797_p1 }
 0xc4a   : > { %p1795_p13 = pneg %p1794_p11 }
 0xc4b   : > { %p1801_p10 = por %p1800_p6, %p1799_p5 }
 0xc4d   : > { %p1802_p12 = pnand %p1801_p10, %p1795_p13 }
 0xc4f   : > { %1805 = shalt.err (!%p1802_p12)
}
 0xc50   : > { %1638 = dma.vmem_to_hbm [thread:$0]  (%p2295_p9), %s2228_s28, 128, %s2226_s29, %s1376_s23  }
 0xc51 PF: > { %p1650_p2 = scmp.ge.s32.totalorder %s1844_s24, 2  ;;  %s1401_s26 = sand.u32 1, %s1832_s21  }
 0xc52   : > { %p2296_p3 = scmp.ne.s32.totalorder %s2289_s14, 0  ;;  %s1402_s17 = scalar_lea.sflag [#allocation5], %s1401_s26 }
 0xc54   : > { %p1645_p4 = pnand %p1650_p2, %p2296_p3 }
 0xc56   : > { %1827 = dma.done.wait (!%p1645_p4), %s1402_s17, 128  }
 0xc57   : > { %1829 = vsyncadd (!%p1645_p4), %s1402_s17, 4294967168  ;;  %s2297_s16 = sld [smem:[#allocation9_spill]]  ;;  %s2298_s23 = sld [smem:[#allocation10_spill]] }
 0xc58   : > { %p23_p7 = scmp.ge.s32.totalorder %s1958_s27, 4   ;;  %s2299_s21 = smov %s1836_s22 }
 0xc59   : > { %s2301_s24 = smov %s1958_s27 }
 0xc5a   :  { %25 = sbr.rel (!%p23_p7) target bundleno = 4 (0x4), region = 109 }
 0xc5d   : > { %s2300_s22 = smov %s2297_s16 }
 0xc61   :  { %1407 = vsyncpa [#allocation4], 1 }
 0xc62   :  { %1409 = vsyncpa [#allocation4 + $0x1], 1 }
 0xc63   :  { %1410 = vsyncpa [#allocation5], 1 }
 0xc64   :  { %1412 = vsyncpa [#allocation5 + $0x1], 1 }

</bundles_post_ra>
